<compile_context>
chip_gen: v7x
topology: tpu7x:2x2x1
jax: 0.10.0
libtpu: 0.0.40
codegen_flags: <defaults>
</compile_context>

<pallas_src>
import functools

import jax
import jax.numpy as jnp
from jax.experimental import pallas as pl
from jax.experimental.pallas import tpu as pltpu


# --------------------------------------------------------------------------
# Helpers
# --------------------------------------------------------------------------

def _round_up(x: int, m: int) -> int:
    return (x + m - 1) // m * m


def _sublane_unit(dtype) -> int:
    """Packed sublane tile height for a dtype (f32:8, bf16:16, 8-bit:32)."""
    return {4: 8, 2: 16, 1: 32}.get(jnp.dtype(dtype).itemsize, 8)


def _pick_divisor_tile(dim: int, pref: int, unit: int) -> int:
    """Largest multiple of `unit` that divides `dim` and is <= pref."""
    t = max(unit, (min(pref, dim) // unit) * unit)
    while dim % t:
        t -= unit
    return t


@functools.lru_cache(maxsize=1)
def _chip_config():
    """(vmem_budget, small_path_budget, tm_pref, tn_pref, tk_pref) per chip gen."""
    vmem_phys = 64 * 1024 * 1024                     # v7x-safe fallback
    try:
        vmem_phys = int(pltpu.get_tpu_info().vmem_capacity_bytes)
    except Exception:
        pass
    if vmem_phys >= 100 * 1024 * 1024:
        # v5e / v6e: 128 MiB physical VMEM -> push scoped limit to ~100 MiB
        # and use big tiles to cut weight/x re-streaming on slower HBM.
        return (100 * 1024 * 1024, 24 * 1024 * 1024, 512, 1024, 1024)
    # v7x: 64 MiB physical per TensorCore -> keep a ~48 MiB hard ceiling and
    # tiles re-derived for that budget (HBM is fast; VMEM correctness first).
    return (48 * 1024 * 1024, 20 * 1024 * 1024, 512, 512, 512)


# --------------------------------------------------------------------------
# Kernels
# --------------------------------------------------------------------------

def _linear_small_kernel(x_ref, wt_ref, b_ref, o_ref, *, compute_dtype):
    # Whole (padded) problem resident in VMEM; one MXU matmul + bias add.
    acc = jnp.dot(x_ref[...].astype(compute_dtype), wt_ref[...],
                  preferred_element_type=jnp.float32)
    o_ref[...] = (acc + b_ref[...]).astype(o_ref.dtype)


def _linear_nok_kernel(x_ref, wt_ref, b_ref, o_ref, *, compute_dtype):
    # Grid: (M//tm, N//tn); whole K in one block -> no accumulator carry.
    acc = jnp.dot(x_ref[...].astype(compute_dtype), wt_ref[...],
                  preferred_element_type=jnp.float32)
    o_ref[...] = (acc + b_ref[...]).astype(o_ref.dtype)


def _linear_tiled_kernel(x_ref, wt_ref, b_ref, o_ref, acc_ref, *, compute_dtype):
    # Grid: (M//tm, N//tn, K//tk); K (reduction) innermost, f32 VMEM accumulator.
    @pl.when(pl.program_id(2) == 0)
    def _():
        acc_ref[...] = jnp.zeros_like(acc_ref)

    acc_ref[...] += jnp.dot(x_ref[...].astype(compute_dtype), wt_ref[...],
                            preferred_element_type=jnp.float32)

    @pl.when(pl.program_id(2) == pl.num_programs(2) - 1)
    def _():
        o_ref[...] = (acc_ref[...] + b_ref[...]).astype(o_ref.dtype)


# --------------------------------------------------------------------------
# Wrappers
# --------------------------------------------------------------------------

def prepare_params(weight, bias, *, compute_dtype=jnp.bfloat16):
    """One-time (parameter-load-time) prep.

    weight: (Out, In) as in nn.Linear.weight; bias: (Out,).
    Transposes to (In, Out), casts the weight to `compute_dtype` (bf16 default:
    native MXU dtype on v5e/v6e/v7x, halves weight HBM traffic; pass None for
    exact f32), and pads K/N up so the tiled path always uses uniform large
    tiles (multiples of 128, and of the preferred tile when the dim exceeds
    one tile). Bias stays f32 (added after the f32 accumulate).
    Returns (wt_padded: (K_pad, N_pad), bias_padded: (1, N_pad)).
    """
    _, _, _, tn_pref, tk_pref = _chip_config()
    out_dim, in_dim = weight.shape
    k_pad = _round_up(in_dim, 128)
    n_pad = _round_up(out_dim, 128)
    if k_pad > tk_pref:
        k_pad = _round_up(k_pad, tk_pref)
    if n_pad > tn_pref:
        n_pad = _round_up(n_pad, tn_pref)
    wt = jnp.pad(weight.T, ((0, k_pad - in_dim), (0, n_pad - out_dim)))
    if compute_dtype is not None:
        wt = wt.astype(compute_dtype)
    b = jnp.pad(bias.astype(jnp.float32), (0, n_pad - out_dim)).reshape(1, n_pad)
    return wt, b


def logistic_regression_forward(x, wt_pad, b_pad, out_dim, *,
                                compute_dtype=jnp.bfloat16):
    """x: (B, In) -> (B, out_dim). wt_pad/b_pad come from prepare_params().

    Note: with the default bf16 compute path, x and W are rounded to bf16
    before the MXU (accumulation is f32) -> ~1e-2-level relative tolerance.
    Pass compute_dtype=None (with matching prepare_params) for exact f32.
    """
    B, in_dim = x.shape
    K_pad, N_pad = wt_pad.shape
    assert K_pad % 128 == 0 and N_pad % 128 == 0, "use prepare_params()"
    out_dtype = x.dtype

    cdtype = jnp.dtype(wt_pad.dtype) if compute_dtype is None else jnp.dtype(compute_dtype)
    vmem_budget, small_budget, tm_pref, tn_pref, tk_pref = _chip_config()
    m_unit = _sublane_unit(cdtype)

    w_item = jnp.dtype(wt_pad.dtype).itemsize
    o_item = jnp.dtype(out_dtype).itemsize

    # Padding of x is only done when unavoidable (K mismatch or unaligned M);
    # in that case the cast to the compute dtype is fused into the same pass.
    need_pad = (in_dim != K_pad) or (B % m_unit != 0)

    # --- small-problem fast path: grid-less, whole problem in VMEM ----------
    M_small = _round_up(B, m_unit) if need_pad else B
    x_small_item = jnp.dtype(cdtype).itemsize if need_pad else jnp.dtype(x.dtype).itemsize
    total_small = (M_small * K_pad * x_small_item
                   + K_pad * N_pad * w_item
                   + 4 * N_pad
                   + M_small * N_pad * o_item)
    if total_small <= small_budget:
        xs = x
        if need_pad:
            xs = jnp.pad(x, ((0, M_small - B), (0, K_pad - in_dim))).astype(cdtype)
        out_pad = pl.pallas_call(
            functools.partial(_linear_small_kernel, compute_dtype=cdtype),
            out_shape=jax.ShapeDtypeStruct((M_small, N_pad), out_dtype),
            compiler_params=pltpu.CompilerParams(
                vmem_limit_bytes=int(min(vmem_budget,
                                         max(2 * total_small, 16 * 1024 * 1024)))),
            cost_estimate=pl.CostEstimate(flops=2 * M_small * K_pad * N_pad,
                                          transcendentals=0,
                                          bytes_accessed=int(total_small)),
        )(xs, wt_pad, b_pad)
        if M_small == B and N_pad == out_dim:
            return out_pad
        return out_pad[:B, :out_dim]

    # --- tiled, pipelined path ----------------------------------------------
    tk = min(tk_pref, K_pad)
    while K_pad % tk and tk > 128:
        tk -= 128
    tn = min(tn_pref, N_pad)
    while N_pad % tn and tn > 128:
        tn -= 128

    if need_pad:
        # x gets one (fused pad+cast) HBM pass anyway -> round M up to a full
        # tm multiple so all tiles are uniform and large.
        tm = min(tm_pref, _round_up(B, m_unit))
        M_pad = _round_up(B, tm)
    else:
        # x is already aligned: avoid the extra HBM pad pass and pick the
        # largest sublane-aligned divisor tile instead.
        M_pad = B
        tm = _pick_divisor_tile(M_pad, tm_pref, m_unit)

    grid_m, grid_n, grid_k = M_pad // tm, N_pad // tn, K_pad // tk

    # v7x megacore: guarantee >=2 parallel blocks so the second TensorCore
    # does not idle when out_dim collapses to a single N tile.
    if grid_m == 1 and grid_n == 1 and tm % (2 * m_unit) == 0:
        tm //= 2
        grid_m = M_pad // tm

    xs = x
    if need_pad:
        xs = jnp.pad(x, ((0, M_pad - B), (0, K_pad - in_dim))).astype(cdtype)
    x_item = jnp.dtype(xs.dtype).itemsize

    # Double-buffered inputs + double-buffered output + f32 accumulator.
    tile_bytes = (2 * (tm * tk * x_item + tk * tn * w_item + tn * 4)
                  + 2 * tm * tn * o_item
                  + tm * tn * 4)
    vmem_limit = int(min(vmem_budget,
                         max(int(1.5 * tile_bytes), 32 * 1024 * 1024)))

    flops = 2 * M_pad * K_pad * N_pad
    bytes_accessed = (M_pad * K_pad * x_item * grid_n       # x re-streamed per N block
                      + K_pad * N_pad * w_item * grid_m     # W re-streamed per M block
                      + 4 * N_pad
                      + M_pad * N_pad * o_item)
    cost = pl.CostEstimate(flops=flops, transcendentals=0,
                           bytes_accessed=int(bytes_accessed))

    if grid_k == 1:
        # Whole K resident -> no reduction axis, no accumulator carry.
        out_pad = pl.pallas_call(
            functools.partial(_linear_nok_kernel, compute_dtype=cdtype),
            out_shape=jax.ShapeDtypeStruct((M_pad, N_pad), out_dtype),
            grid_spec=pltpu.PrefetchScalarGridSpec(
                num_scalar_prefetch=0,
                grid=(grid_m, grid_n),
                in_specs=[
                    pl.BlockSpec((tm, K_pad), lambda i, j: (i, 0)),
                    pl.BlockSpec((K_pad, tn), lambda i, j: (0, j)),
                    pl.BlockSpec((1, tn), lambda i, j: (0, j)),
                ],
                out_specs=pl.BlockSpec((tm, tn), lambda i, j: (i, j)),
            ),
            compiler_params=pltpu.CompilerParams(
                dimension_semantics=("parallel", "parallel"),
                vmem_limit_bytes=vmem_limit),
            cost_estimate=cost,
        )(xs, wt_pad, b_pad)
    else:
        out_pad = pl.pallas_call(
            functools.partial(_linear_tiled_kernel, compute_dtype=cdtype),
            out_shape=jax.ShapeDtypeStruct((M_pad, N_pad), out_dtype),
            grid_spec=pltpu.PrefetchScalarGridSpec(
                num_scalar_prefetch=0,
                grid=(grid_m, grid_n, grid_k),
                in_specs=[
                    pl.BlockSpec((tm, tk), lambda i, j, k: (i, k)),
                    pl.BlockSpec((tk, tn), lambda i, j, k: (k, j)),
                    # Bias: constant across i and k -> stays resident in VMEM.
                    pl.BlockSpec((1, tn), lambda i, j, k: (0, j)),
                ],
                out_specs=pl.BlockSpec((tm, tn), lambda i, j, k: (i, j)),
                scratch_shapes=[pltpu.VMEM((tm, tn), jnp.float32)],
            ),
            compiler_params=pltpu.CompilerParams(
                # M/N parallel -> shards across both TensorCores on v7x;
                # K is the reduction axis (accumulator carried across it).
                dimension_semantics=("parallel", "parallel", "arbitrary"),
                vmem_limit_bytes=vmem_limit),
            cost_estimate=cost,
        )(xs, wt_pad, b_pad)

    if M_pad == B and N_pad == out_dim:
        return out_pad
    return out_pad[:B, :out_dim]


# --------------------------------------------------------------------------
# Example / self-test
# --------------------------------------------------------------------------

if __name__ == "__main__":
    key = jax.random.PRNGKey(0)
    kx, kw, kb, kx2, kw2, kb2 = jax.random.split(key, 6)

    # --- small shapes implied by the module: (batch, input_dim) -> (batch, out_dim)
    batch, input_dim, out_dim = 8, 32, 16
    x = jax.random.normal(kx, (batch, input_dim), dtype=jnp.float32)
    bound = 1.0 / jnp.sqrt(jnp.float32(input_dim))
    weight = jax.random.uniform(kw, (out_dim, input_dim), jnp.float32, -bound, bound)
    bias = jax.random.uniform(kb, (out_dim,), jnp.float32, -bound, bound)

    ref = x @ weight.T + bias

    # Default path: bf16 compute on the MXU, f32 accumulation.
    wt_p, b_p = prepare_params(weight, bias)          # one-time param prep
    out = jax.block_until_ready(logistic_regression_forward(x, wt_p, b_p, out_dim))
    assert out.shape == (batch, out_dim)
    assert jnp.allclose(out, ref, atol=2e-2, rtol=2e-2)

    # Exact-f32 path.
    wt_f, b_f = prepare_params(weight, bias, compute_dtype=None)
    out_f = jax.block_until_ready(
        logistic_regression_forward(x, wt_f, b_f, out_dim, compute_dtype=None))
    assert jnp.allclose(out_f, ref, atol=1e-5, rtol=1e-5)

    # --- larger shapes: exercises the tiled / accumulator (or no-K) path ----
    B2, In2, Out2 = 2048, 2048, 1024
    x2 = jax.random.normal(kx2, (B2, In2), dtype=jnp.float32)
    bound2 = 1.0 / jnp.sqrt(jnp.float32(In2))
    w2 = jax.random.uniform(kw2, (Out2, In2), jnp.float32, -bound2, bound2)
    b2 = jax.random.uniform(kb2, (Out2,), jnp.float32, -bound2, bound2)

    wt2_p, b2_p = prepare_params(w2, b2)
    out2 = jax.block_until_ready(
        logistic_regression_forward(x2, wt2_p, b2_p, Out2))
    # Reference with the same bf16 input rounding (f32 accumulation).
    ref2 = jnp.dot(x2.astype(jnp.bfloat16).astype(jnp.float32),
                   w2.T.astype(jnp.bfloat16).astype(jnp.float32),
                   precision=jax.lax.Precision.HIGHEST) + b2
    assert out2.shape == (B2, Out2)
    assert jnp.allclose(out2, ref2, atol=2e-2, rtol=2e-2)

    print("KERNEL_OK")
</pallas_src>

<mosaic_0001>
module attributes {stable_mosaic.version = 11 : i64} {
  func.func @_linear_small_kernel(%arg0: memref<16x128xbf16, #tpu.memory_space<vmem>>, %arg1: memref<128x128xbf16, #tpu.memory_space<vmem>>, %arg2: memref<1x128xf32, #tpu.memory_space<vmem>>, %arg3: memref<16x128xf32, #tpu.memory_space<vmem>>) attributes {dimension_semantics = [], scalar_prefetch = 0 : i64, scratch_operands = 0 : i64, tpu.core_type = #tpu.core_type<tc>} {
    %c0 = arith.constant 0 : index
    %c0_0 = arith.constant 0 : index
    %0 = vector.load %arg0[%c0, %c0_0] : memref<16x128xbf16, #tpu.memory_space<vmem>>, vector<16x128xbf16>
    %c0_1 = arith.constant 0 : index
    %c0_2 = arith.constant 0 : index
    %1 = vector.load %arg1[%c0_1, %c0_2] : memref<128x128xbf16, #tpu.memory_space<vmem>>, vector<128x128xbf16>
    %cst = arith.constant dense<0.000000e+00> : vector<16x128xf32>
    %2 = tpu.matmul %0, %1, %cst {dimension_numbers = #tpu.dot_dimension_numbers<[1], [0], [0], [1], [0, 0, 1, 1], [], []>} : vector<16x128xbf16>, vector<128x128xbf16>, vector<16x128xf32> -> vector<16x128xf32>
    %c0_3 = arith.constant 0 : index
    %c0_4 = arith.constant 0 : index
    %3 = vector.load %arg2[%c0_3, %c0_4] : memref<1x128xf32, #tpu.memory_space<vmem>>, vector<1x128xf32>
    %4 = vector.broadcast %3 : vector<1x128xf32> to vector<16x128xf32>
    %5 = arith.addf %2, %4 : vector<16x128xf32>
    %c0_5 = arith.constant 0 : index
    %c0_6 = arith.constant 0 : index
    %6 = vector.load %arg3[%c0_5, %c0_6] : memref<16x128xf32, #tpu.memory_space<vmem>>, vector<16x128xf32>
    tpu.vector_store %arg3[%c0_5, %c0_6], %5 {strides = array<i32>} : memref<16x128xf32, #tpu.memory_space<vmem>>, vector<16x128xf32>,
    return
  }
}

</mosaic_0001>

<bundles_post_ra>
// kernel: tpu_custom_call.1
= control target key start
LH: loop header
LB: loop body
LE: loop exit
PB: predicated region body
PF: predicated region fallthrough
CT: control target
= control target key end

     0   :  { %8 = vsyncpa [#allocation3], 0  ;;  %s381_s0 = inlined_call_operand.hbm [shape: bf16[16,128], index: 0, kind: input, shape index: {}]   ;;  %s382_s1 = inlined_call_operand.hbm [shape: bf16[128,128], index: 1, kind: input, shape index: {}]   ;;  %s383_s2 = inlined_call_operand.vmem [shape: f32[1,128], index: 2, kind: input, shape index: {}]   ;;  %s384_s3 = inlined_call_operand.hbm [shape: f32[16,128], index: 3, kind: output, shape index: {}]  }
   0x1   :  { %9 = vsyncpa [#allocation6], 0 }
   0x2   :  { %10 = vsyncpa [#allocation4], 0  ;;  %s313_s12 = smov [#allocation2]   ;;  %s241_s16 = scalar_lea.hbm %s381_s0, 128 }
   0x3   :  { %s16_s13 = sshll.u32 %s313_s12, 4  ;;  %p242_p0 = scmp.ne.s32.totalorder %s381_s0, %s241_s16  ;;  %s17_s13 = int_to_ptr.vmem [resolvable:$true] %s16_s13 }
   0x4   :  { %p245_p1 = scmp.lt.u32.totalorder %s241_s16, %s381_s0 }
   0x6   :  { %p247_p2 = pnand %p245_p1, %p242_p0 }
   0x8   :  { %250 = shalt.err (!%p247_p2)
}
   0x9   :  { %s251_s21 = scalar_lea.vmem %s17_s13, 128  ;;  %p256_p4 = scmp.lt.s32.totalorder %s17_s13, %s17_s13 }
   0xa   :  { %p252_p3 = scmp.ne.s32.totalorder %s17_s13, %s251_s21  ;;  %p257_p5 = scmp.lt.s32.totalorder %s251_s21, %s251_s21 }
   0xc   :  { %p258_p6 = por %p257_p5, %p256_p4 }
   0xe   :  { %p259_p7 = pnand %p258_p6, %p252_p3 }
  0x10   :  { %262 = shalt.err (!%p259_p7)
}
  0x11   :  { %s314_s22 = smov 64   ;;  %s315_s23 = smov 4  }
  0x12   :  { %22 = dma.hbm_to_vmem [thread:$0]  %s381_s0, 128, %s17_s13, [#allocation3], %s314_s22, %s314_s22, %s315_s23  }
  0x13   :  { %s316_s26 = smov [#allocation5]   ;;  %s263_s30 = scalar_lea.hbm %s382_s1, 1024 }
  0x14   :  { %s28_s27 = sshll.u32 %s316_s26, 4  ;;  %p264_p8 = scmp.ne.s32.totalorder %s382_s1, %s263_s30  ;;  %s29_s27 = int_to_ptr.vmem [resolvable:$true] %s28_s27 }
  0x15   :  { %p267_p9 = scmp.lt.u32.totalorder %s263_s30, %s382_s1 }
  0x17   :  { %p269_p10 = pnand %p267_p9, %p264_p8 }
  0x19   :  { %272 = shalt.err (!%p269_p10)
}
  0x1a   :  { %s273_s8 = scalar_lea.vmem %s29_s27, 1024  ;;  %p278_p12 = scmp.lt.s32.totalorder %s29_s27, %s29_s27 }
  0x1b   :  { %p274_p11 = scmp.ne.s32.totalorder %s29_s27, %s273_s8  ;;  %p279_p13 = scmp.lt.s32.totalorder %s273_s8, %s273_s8 }
  0x1d   :  { %p280_p0 = por %p279_p13, %p278_p12 }
  0x1f   :  { %p281_p1 = pnand %p280_p0, %p274_p11 }
  0x21   :  { %284 = shalt.err (!%p281_p1)
}
  0x22   :  { %34 = dma.hbm_to_vmem [thread:$0]  %s382_s1, 1024, %s29_s27, [#allocation6], %s314_s22, %s314_s22, %s315_s23  }
  0x23   :  { %307 = dma.done.wait [#allocation3], 128  }
  0x24   :  { %308 = vsyncadd [#allocation3], 4294967168 }
  0x25   :  { %309 = dma.done.wait [#allocation6], 1024  }
  0x26   :  { %310 = vsyncadd [#allocation6], 4294966272  ;;  %v317_v0 = vmov 0.0   ;;  %vm318_vm0 = vmmov 0   ;;  %v232_v1 = vld [vmem:[#allocation5] sm:$0xff]   ;;  %v233_v2 = vld [vmem:[#allocation5 + $0x8] sm:$0xff]  }
  0x27   :  { %203 = vmatprep.subr.bf16.mxu0 %v317_v0  ;;  %219 = vmatprep.mubr.msk.bf16.mxu0 %vm318_vm0, %v317_v0  ;;  %v234_v3 = vld [vmem:[#allocation5 + $0x10] sm:$0xff]   ;;  %v235_v4 = vld [vmem:[#allocation5 + $0x18] sm:$0xff]   ;;  %v236_v5 = vld [vmem:[#allocation5 + $0x20] sm:$0xff]   ;;  %s319_s11 = smov [#allocation7]  }
  0x28   :  { %204 = vmatpush3.bf16.msra.mxu0 %v232_v1  ;;  %v237_v6 = vld [vmem:[#allocation5 + $0x28] sm:$0xff]   ;;  %v238_v7 = vld [vmem:[#allocation5 + $0x30] sm:$0xff]   ;;  %v239_v8 = vld [vmem:[#allocation5 + $0x38] sm:$0xff]   ;;  %s171_s12 = sshll.u32 %s319_s11, 4  ;;  %s172_s12 = int_to_ptr.vmem [resolvable:$true] %s171_s12 }
  0x29   :  { %205 = vmatprep.subr.bf16.mxu0 %v317_v0  ;;  %v240_v9 = vld [vmem:[#allocation2] sm:$0xff]   ;;  %s285_s13 = scalar_lea.vmem %s172_s12, 256  ;;  %p290_p3 = scmp.lt.s32.totalorder %s172_s12, %s172_s12 }
  0x2a   :  { %v184_v10 = vld [vmem:[%s383_s2] ss:$0 sm:$0xff]  ;;  %p286_p2 = scmp.ne.s32.totalorder %s172_s12, %s285_s13  ;;  %p291_p4 = scmp.lt.s32.totalorder %s285_s13, %s285_s13 }
  0x2c   :  { %206 = vmatpush3.bf16.msra.mxu0 %v233_v2  ;;  %p292_p5 = por %p291_p4, %p290_p3 }
  0x2d   :  { %207 = vmatprep.subr.bf16.mxu0 %v317_v0 }
  0x2e   :  { %p293_p6 = pnand %p292_p5, %p286_p2 }
  0x30   :  { %208 = vmatpush3.bf16.msra.mxu0 %v234_v3 }
  0x31   :  { %209 = vmatprep.subr.bf16.mxu0 %v317_v0 }
  0x34   :  { %210 = vmatpush3.bf16.msra.mxu0 %v235_v4 }
  0x35   :  { %211 = vmatprep.subr.bf16.mxu0 %v317_v0 }
  0x38   :  { %212 = vmatpush3.bf16.msra.mxu0 %v236_v5 }
  0x39   :  { %213 = vmatprep.subr.bf16.mxu0 %v317_v0 }
  0x3c   :  { %214 = vmatpush3.bf16.msra.mxu0 %v237_v6 }
  0x3d   :  { %215 = vmatprep.subr.bf16.mxu0 %v317_v0 }
  0x40   :  { %216 = vmatpush3.bf16.msra.mxu0 %v238_v7 }
  0x41   :  { %217 = vmatprep.subr.bf16.mxu0 %v317_v0 }
  0x44   :  { %218 = vmatpush3.bf16.msra.mxu0 %v239_v8 }
  0x47   :  { %220 = vmatmul.mubr.bf16.vlgmr.msra.gmra.mrb[0].mxu0 %v240_v9 }
 0x11a   :  { %v157_v11 = vpop.f32.mrb[0].mxu0 }
 0x11b   :  { %v158_v12 = vadd.f32 %v184_v10, %v157_v11  ;;  %v221_v13 = vpop.f32.mrb[1].mxu0 }
 0x11c   :  { %v160_v14 = vpop.f32.mrb[2].mxu0 }
 0x11d   :  { %164 = vst [vmem:[#allocation7] sm:$0xff] %v158_v12  ;;  %v161_v15 = vadd.f32 %v184_v10, %v160_v14  ;;  %v222_v16 = vpop.f32.mrb[3].mxu0 }
 0x11f   :  { %165 = vst [vmem:[#allocation7 + $0x8] sm:$0xff] %v161_v15 }
 0x120   :  { %296 = shalt.err (!%p293_p6)
}
 0x121   :  { %s297_s15 = scalar_lea.hbm %s384_s3, 256 }
 0x122   :  { %p298_p7 = scmp.ne.s32.totalorder %s384_s3, %s297_s15  ;;  %p301_p8 = scmp.lt.u32.totalorder %s297_s15, %s384_s3 }
 0x124   :  { %p303_p9 = pnand %p301_p8, %p298_p7 }
 0x126   :  { %306 = shalt.err (!%p303_p9)
}
 0x127   :  { %s320_s20 = smov 128   ;;  %s321_s21 = smov 8  }
 0x128   :  { %177 = dma.vmem_to_hbm [thread:$0]  %s172_s12, 256, %s384_s3, [#allocation4], %s320_s20, %s320_s20, %s321_s21  }
 0x129   :  { %311 = dma.done.wait [#allocation4], 256  }
 0x12a   :  { %312 = vsyncadd [#allocation4], 4294967040 }
 0x12b   :  { %181 = vsyncpa [#allocation3], 1 }
 0x12c   :  { %182 = vsyncpa [#allocation6], 1 }
 0x12d   :  { %183 = vsyncpa [#allocation4], 1 }

</bundles_post_ra>
